<compile_context>
chip_gen: v7x
topology: tpu7x:2x2x1
jax: 0.10.0
libtpu: 0.0.40
codegen_flags: <defaults>
</compile_context>

<pallas_src>
import functools

import jax
import jax.numpy as jnp
from jax.experimental import pallas as pl
from jax.experimental.pallas import tpu as pltpu

W = 256
D = W // 2              # 128: input width, hidden width, and output width
N_LAYERS = 6            # 5 x (Linear + ReLU) + final Linear (no activation)


def lerf_kernel(x_ref, w_ref, b_ref, out_ref):
    """Runs one (tm, 128) tile of rows through the whole 6-layer MLP."""
    h = x_ref[...].astype(jnp.float32)
    for l in range(N_LAYERS):           # static unroll; weights resident in VMEM
        y = jnp.dot(h.astype(jnp.bfloat16), w_ref[l],
                    preferred_element_type=jnp.float32) + b_ref[l]
        h = jnp.maximum(y, 0.0) if l < N_LAYERS - 1 else y
    out_ref[...] = h.astype(out_ref.dtype)


def init_params(key):
    """PyTorch-style (uniform +-1/sqrt(fan_in)) init for the 6 Linear layers.

    Weights are stored as (in_features, out_features), so y = x @ W + b matches
    PyTorch's x @ W_pt.T + b.
    """
    params = []
    for k in jax.random.split(key, N_LAYERS):
        kw, kb = jax.random.split(k)
        bound = 1.0 / jnp.sqrt(D)
        w = jax.random.uniform(kw, (D, D), jnp.float32, -bound, bound)
        b = jax.random.uniform(kb, (1, D), jnp.float32, -bound, bound)
        params.append((w, b))
    return params


def _round_up(x, m):
    return (x + m - 1) // m * m


@functools.partial(jax.jit, static_argnames=("tm",))
def lerf_forward(xyz, params, tm=1024):
    """Pallas implementation of Lerf.forward (the clip_net head)."""
    lead_shape = xyz.shape[:-1]
    x = xyz.reshape(-1, D).astype(jnp.float32)
    n = x.shape[0]

    # Effective row tile: large for big N, shrunk (multiple of 8) for small N.
    # Rows are zero-padded up to a multiple of the tile and sliced off at the end.
    tm_eff = min(tm, max(8, _round_up(n, 8)))
    n_pad = _round_up(n, tm_eff)
    if n_pad != n:
        x = jnp.pad(x, ((0, n_pad - n), (0, 0)))

    # Pack weights / biases into single slabs: fewer operands, fewer DMA streams,
    # less VMEM bookkeeping.  Weights go to bf16 for the MXU; biases stay f32.
    wstack = jnp.stack([w for w, _ in params]).astype(jnp.bfloat16)  # (6,128,128)
    bstack = jnp.stack([b for _, b in params])                       # (6,1,128) f32

    out = pl.pallas_call(
        lerf_kernel,
        out_shape=jax.ShapeDtypeStruct((n_pad, D), jnp.float32),
        grid_spec=pltpu.PrefetchScalarGridSpec(
            num_scalar_prefetch=0,
            grid=(n_pad // tm_eff,),
            in_specs=[
                pl.BlockSpec((tm_eff, D), lambda i: (i, 0)),
                pl.BlockSpec((N_LAYERS, D, D), lambda i: (0, 0, 0)),
                pl.BlockSpec((N_LAYERS, 1, D), lambda i: (0, 0, 0)),
            ],
            out_specs=pl.BlockSpec((tm_eff, D), lambda i: (i, 0)),
        ),
        compiler_params=pltpu.CompilerParams(
            dimension_semantics=("parallel",)),
    )(x, wstack, bstack)

    return out[:n].reshape(*lead_shape, D)


def reference_forward(xyz, params):
    """Pure-JAX reference mirroring the kernel's bf16-matmul / f32-accumulate."""
    h = xyz.reshape(-1, D).astype(jnp.float32)
    for l, (w, b) in enumerate(params):
        y = jnp.dot(h.astype(jnp.bfloat16), w.astype(jnp.bfloat16),
                    preferred_element_type=jnp.float32) + b
        h = jnp.maximum(y, 0.0) if l < N_LAYERS - 1 else y
    return h.reshape(*xyz.shape[:-1], D)


if __name__ == "__main__":
    key = jax.random.PRNGKey(0)
    kx, kp = jax.random.split(key)

    # xyz: (N_rays=2, N_samples=8, 128) -> flattened to (16, 128) in forward.
    xyz = jax.random.normal(kx, (2, 8, D), dtype=jnp.float32)
    params = init_params(kp)

    out = lerf_forward(xyz, params)
    jax.block_until_ready(out)

    ref = reference_forward(xyz, params)
    assert out.shape == (2, 8, D)
    assert jnp.allclose(out, ref, atol=1e-2, rtol=1e-2), float(
        jnp.max(jnp.abs(out - ref)))

    print("KERNEL_OK")
</pallas_src>

<mosaic_0001>
module attributes {stable_mosaic.version = 11 : i64} {
  func.func @lerf_kernel(%arg0: i32, %arg1: memref<16x128xf32, #tpu.memory_space<vmem>>, %arg2: memref<6x128x128xbf16, #tpu.memory_space<vmem>>, %arg3: memref<6x1x128xf32, #tpu.memory_space<vmem>>, %arg4: memref<16x128xf32, #tpu.memory_space<vmem>>) attributes {dimension_semantics = [#tpu.dimension_semantics<parallel>], iteration_bounds = array<i64: 1>, scalar_prefetch = 0 : i64, scratch_operands = 0 : i64, tpu.core_type = #tpu.core_type<tc>, window_params = [{transform_indices = @transform_0, window_bounds = array<i64: 16, 128>}, {pipeline_mode = #tpu.pipeline_mode<synchronous>, transform_indices = @transform_1, window_bounds = array<i64: 6, 128, 128>}, {pipeline_mode = #tpu.pipeline_mode<synchronous>, transform_indices = @transform_2, window_bounds = array<i64: 6, 1, 128>}, {transform_indices = @transform_3, window_bounds = array<i64: 16, 128>}]} {
    %c0 = arith.constant 0 : index
    %c0_0 = arith.constant 0 : index
    %0 = vector.load %arg1[%c0, %c0_0] : memref<16x128xf32, #tpu.memory_space<vmem>>, vector<16x128xf32>
    %1 = arith.truncf %0 : vector<16x128xf32> to vector<16x128xbf16>
    %c0_1 = arith.constant 0 : index
    %c0_2 = arith.constant 0 : index
    %c0_3 = arith.constant 0 : index
    %2 = vector.load %arg2[%c0_1, %c0_2, %c0_3] : memref<6x128x128xbf16, #tpu.memory_space<vmem>>, vector<1x128x128xbf16>
    %3 = vector.shape_cast %2 : vector<1x128x128xbf16> to vector<128x128xbf16>
    %cst = arith.constant dense<0.000000e+00> : vector<16x128xf32>
    %4 = tpu.matmul %1, %3, %cst {dimension_numbers = #tpu.dot_dimension_numbers<[1], [0], [0], [1], [0, 0, 1, 1], [], []>} : vector<16x128xbf16>, vector<128x128xbf16>, vector<16x128xf32> -> vector<16x128xf32>
    %c0_4 = arith.constant 0 : index
    %c0_5 = arith.constant 0 : index
    %c0_6 = arith.constant 0 : index
    %5 = vector.load %arg3[%c0_4, %c0_5, %c0_6] : memref<6x1x128xf32, #tpu.memory_space<vmem>>, vector<1x1x128xf32>
    %6 = vector.shape_cast %5 : vector<1x1x128xf32> to vector<1x128xf32>
    %7 = vector.broadcast %6 : vector<1x128xf32> to vector<16x128xf32>
    %8 = arith.addf %4, %7 : vector<16x128xf32>
    %cst_7 = arith.constant 0.000000e+00 : f32
    %9 = vector.broadcast %cst_7 : f32 to vector<16x128xf32>
    %10 = arith.maximumf %8, %9 : vector<16x128xf32>
    %11 = arith.truncf %10 : vector<16x128xf32> to vector<16x128xbf16>
    %c1 = arith.constant 1 : index
    %c0_8 = arith.constant 0 : index
    %c0_9 = arith.constant 0 : index
    %12 = vector.load %arg2[%c1, %c0_8, %c0_9] : memref<6x128x128xbf16, #tpu.memory_space<vmem>>, vector<1x128x128xbf16>
    %13 = vector.shape_cast %12 : vector<1x128x128xbf16> to vector<128x128xbf16>
    %cst_10 = arith.constant dense<0.000000e+00> : vector<16x128xf32>
    %14 = tpu.matmul %11, %13, %cst_10 {dimension_numbers = #tpu.dot_dimension_numbers<[1], [0], [0], [1], [0, 0, 1, 1], [], []>} : vector<16x128xbf16>, vector<128x128xbf16>, vector<16x128xf32> -> vector<16x128xf32>
    %c1_11 = arith.constant 1 : index
    %c0_12 = arith.constant 0 : index
    %c0_13 = arith.constant 0 : index
    %15 = vector.load %arg3[%c1_11, %c0_12, %c0_13] : memref<6x1x128xf32, #tpu.memory_space<vmem>>, vector<1x1x128xf32>
    %16 = vector.shape_cast %15 : vector<1x1x128xf32> to vector<1x128xf32>
    %17 = vector.broadcast %16 : vector<1x128xf32> to vector<16x128xf32>
    %18 = arith.addf %14, %17 : vector<16x128xf32>
    %cst_14 = arith.constant 0.000000e+00 : f32
    %19 = vector.broadcast %cst_14 : f32 to vector<16x128xf32>
    %20 = arith.maximumf %18, %19 : vector<16x128xf32>
    %21 = arith.truncf %20 : vector<16x128xf32> to vector<16x128xbf16>
    %c2 = arith.constant 2 : index
    %c0_15 = arith.constant 0 : index
    %c0_16 = arith.constant 0 : index
    %22 = vector.load %arg2[%c2, %c0_15, %c0_16] : memref<6x128x128xbf16, #tpu.memory_space<vmem>>, vector<1x128x128xbf16>
    %23 = vector.shape_cast %22 : vector<1x128x128xbf16> to vector<128x128xbf16>
    %cst_17 = arith.constant dense<0.000000e+00> : vector<16x128xf32>
    %24 = tpu.matmul %21, %23, %cst_17 {dimension_numbers = #tpu.dot_dimension_numbers<[1], [0], [0], [1], [0, 0, 1, 1], [], []>} : vector<16x128xbf16>, vector<128x128xbf16>, vector<16x128xf32> -> vector<16x128xf32>
    %c2_18 = arith.constant 2 : index
    %c0_19 = arith.constant 0 : index
    %c0_20 = arith.constant 0 : index
    %25 = vector.load %arg3[%c2_18, %c0_19, %c0_20] : memref<6x1x128xf32, #tpu.memory_space<vmem>>, vector<1x1x128xf32>
    %26 = vector.shape_cast %25 : vector<1x1x128xf32> to vector<1x128xf32>
    %27 = vector.broadcast %26 : vector<1x128xf32> to vector<16x128xf32>
    %28 = arith.addf %24, %27 : vector<16x128xf32>
    %cst_21 = arith.constant 0.000000e+00 : f32
    %29 = vector.broadcast %cst_21 : f32 to vector<16x128xf32>
    %30 = arith.maximumf %28, %29 : vector<16x128xf32>
    %31 = arith.truncf %30 : vector<16x128xf32> to vector<16x128xbf16>
    %c3 = arith.constant 3 : index
    %c0_22 = arith.constant 0 : index
    %c0_23 = arith.constant 0 : index
    %32 = vector.load %arg2[%c3, %c0_22, %c0_23] : memref<6x128x128xbf16, #tpu.memory_space<vmem>>, vector<1x128x128xbf16>
    %33 = vector.shape_cast %32 : vector<1x128x128xbf16> to vector<128x128xbf16>
    %cst_24 = arith.constant dense<0.000000e+00> : vector<16x128xf32>
    %34 = tpu.matmul %31, %33, %cst_24 {dimension_numbers = #tpu.dot_dimension_numbers<[1], [0], [0], [1], [0, 0, 1, 1], [], []>} : vector<16x128xbf16>, vector<128x128xbf16>, vector<16x128xf32> -> vector<16x128xf32>
    %c3_25 = arith.constant 3 : index
    %c0_26 = arith.constant 0 : index
    %c0_27 = arith.constant 0 : index
    %35 = vector.load %arg3[%c3_25, %c0_26, %c0_27] : memref<6x1x128xf32, #tpu.memory_space<vmem>>, vector<1x1x128xf32>
    %36 = vector.shape_cast %35 : vector<1x1x128xf32> to vector<1x128xf32>
    %37 = vector.broadcast %36 : vector<1x128xf32> to vector<16x128xf32>
    %38 = arith.addf %34, %37 : vector<16x128xf32>
    %cst_28 = arith.constant 0.000000e+00 : f32
    %39 = vector.broadcast %cst_28 : f32 to vector<16x128xf32>
    %40 = arith.maximumf %38, %39 : vector<16x128xf32>
    %41 = arith.truncf %40 : vector<16x128xf32> to vector<16x128xbf16>
    %c4 = arith.constant 4 : index
    %c0_29 = arith.constant 0 : index
    %c0_30 = arith.constant 0 : index
    %42 = vector.load %arg2[%c4, %c0_29, %c0_30] : memref<6x128x128xbf16, #tpu.memory_space<vmem>>, vector<1x128x128xbf16>
    %43 = vector.shape_cast %42 : vector<1x128x128xbf16> to vector<128x128xbf16>
    %cst_31 = arith.constant dense<0.000000e+00> : vector<16x128xf32>
    %44 = tpu.matmul %41, %43, %cst_31 {dimension_numbers = #tpu.dot_dimension_numbers<[1], [0], [0], [1], [0, 0, 1, 1], [], []>} : vector<16x128xbf16>, vector<128x128xbf16>, vector<16x128xf32> -> vector<16x128xf32>
    %c4_32 = arith.constant 4 : index
    %c0_33 = arith.constant 0 : index
    %c0_34 = arith.constant 0 : index
    %45 = vector.load %arg3[%c4_32, %c0_33, %c0_34] : memref<6x1x128xf32, #tpu.memory_space<vmem>>, vector<1x1x128xf32>
    %46 = vector.shape_cast %45 : vector<1x1x128xf32> to vector<1x128xf32>
    %47 = vector.broadcast %46 : vector<1x128xf32> to vector<16x128xf32>
    %48 = arith.addf %44, %47 : vector<16x128xf32>
    %cst_35 = arith.constant 0.000000e+00 : f32
    %49 = vector.broadcast %cst_35 : f32 to vector<16x128xf32>
    %50 = arith.maximumf %48, %49 : vector<16x128xf32>
    %51 = arith.truncf %50 : vector<16x128xf32> to vector<16x128xbf16>
    %c5 = arith.constant 5 : index
    %c0_36 = arith.constant 0 : index
    %c0_37 = arith.constant 0 : index
    %52 = vector.load %arg2[%c5, %c0_36, %c0_37] : memref<6x128x128xbf16, #tpu.memory_space<vmem>>, vector<1x128x128xbf16>
    %53 = vector.shape_cast %52 : vector<1x128x128xbf16> to vector<128x128xbf16>
    %cst_38 = arith.constant dense<0.000000e+00> : vector<16x128xf32>
    %54 = tpu.matmul %51, %53, %cst_38 {dimension_numbers = #tpu.dot_dimension_numbers<[1], [0], [0], [1], [0, 0, 1, 1], [], []>} : vector<16x128xbf16>, vector<128x128xbf16>, vector<16x128xf32> -> vector<16x128xf32>
    %c5_39 = arith.constant 5 : index
    %c0_40 = arith.constant 0 : index
    %c0_41 = arith.constant 0 : index
    %55 = vector.load %arg3[%c5_39, %c0_40, %c0_41] : memref<6x1x128xf32, #tpu.memory_space<vmem>>, vector<1x1x128xf32>
    %56 = vector.shape_cast %55 : vector<1x1x128xf32> to vector<1x128xf32>
    %57 = vector.broadcast %56 : vector<1x128xf32> to vector<16x128xf32>
    %58 = arith.addf %54, %57 : vector<16x128xf32>
    %c0_42 = arith.constant 0 : index
    %c0_43 = arith.constant 0 : index
    %59 = vector.load %arg4[%c0_42, %c0_43] : memref<16x128xf32, #tpu.memory_space<vmem>>, vector<16x128xf32>
    tpu.vector_store %arg4[%c0_42, %c0_43], %58 {strides = array<i32>} : memref<16x128xf32, #tpu.memory_space<vmem>>, vector<16x128xf32>,
    return
  }
  func.func @transform_0(%arg0: i32) -> (i32, i32) {
    %c0_i32 = arith.constant 0 : i32
    %c0_i32_0 = arith.constant 0 : i32
    return %arg0, %c0_i32 : i32, i32
  }
  func.func @transform_1(%arg0: i32) -> (i32, i32, i32) {
    %c0_i32 = arith.constant 0 : i32
    %c0_i32_0 = arith.constant 0 : i32
    %c0_i32_1 = arith.constant 0 : i32
    %c0_i32_2 = arith.constant 0 : i32
    return %c0_i32, %c0_i32_0, %c0_i32_1 : i32, i32, i32
  }
  func.func @transform_2(%arg0: i32) -> (i32, i32, i32) {
    %c0_i32 = arith.constant 0 : i32
    %c0_i32_0 = arith.constant 0 : i32
    %c0_i32_1 = arith.constant 0 : i32
    %c0_i32_2 = arith.constant 0 : i32
    return %c0_i32, %c0_i32_0, %c0_i32_1 : i32, i32, i32
  }
  func.func @transform_3(%arg0: i32) -> (i32, i32) {
    %c0_i32 = arith.constant 0 : i32
    %c0_i32_0 = arith.constant 0 : i32
    return %arg0, %c0_i32 : i32, i32
  }
}

</mosaic_0001>

<bundles_post_ra>
// kernel: lerf_forward.1
= control target key start
LH: loop header
LB: loop body
LE: loop exit
PB: predicated region body
PF: predicated region fallthrough
CT: control target
= control target key end

     0   :  { %v1124_v1 = vmov 0.0   ;;  %vm1125_vm0 = vmmov 0   ;;  %s1389_s0 = inlined_call_operand.vmem [shape: f32[16,128], index: 0, kind: input, shape index: {}]   ;;  %s1390_s1 = inlined_call_operand.vmem [shape: bf16[6,128,128], index: 1, kind: input, shape index: {}]   ;;  %s1391_s2 = inlined_call_operand.vmem [shape: f32[6,1,128], index: 2, kind: input, shape index: {}]   ;;  %s1392_s3 = inlined_call_operand.hbm [shape: f32[16,128], index: 3, kind: output, shape index: {}]  }
   0x1   :  { %v1052_v0 = vld [vmem:[%s1390_s1] sm:$0xff]   ;;  %927 = vmatprep.subr.bf16.mxu0 %v1124_v1  ;;  %947 = vmatprep.subr.bf16.mxu1 %v1124_v1  ;;  %v1053_v2 = vld [vmem:[%s1390_s1 + $0x8] sm:$0xff]   ;;  %v1054_v3 = vld [vmem:[%s1390_s1 + $0x10] sm:$0xff]  }
   0x2   :  { %928 = vmatpush3.bf16.msra.mxu0 %v1052_v0  ;;  %943 = vmatprep.mubr.msk.bf16.mxu0 %vm1125_vm0, %v1124_v1  ;;  %v1060_v4 = vld [vmem:[%s1390_s1 + $0x40] sm:$0xff]   ;;  %v1055_v5 = vld [vmem:[%s1390_s1 + $0x18] sm:$0xff]   ;;  %v1061_v6 = vld [vmem:[%s1390_s1 + $0x48] sm:$0xff]  }
   0x3   :  { %929 = vmatprep.subr.bf16.mxu0 %v1124_v1  ;;  %963 = vmatprep.mubr.msk.bf16.mxu1 %vm1125_vm0, %v1124_v1  ;;  %v1056_v7 = vld [vmem:[%s1390_s1 + $0x20] sm:$0xff]   ;;  %v1062_v8 = vld [vmem:[%s1390_s1 + $0x50] sm:$0xff]   ;;  %v1057_v9 = vld [vmem:[%s1390_s1 + $0x28] sm:$0xff]  }
   0x4   :  { %948 = vmatpush3.bf16.msra.mxu1 %v1060_v4  ;;  %v1063_v10 = vld [vmem:[%s1390_s1 + $0x58] sm:$0xff]   ;;  %v1058_v11 = vld [vmem:[%s1390_s1 + $0x30] sm:$0xff]   ;;  %v1064_v12 = vld [vmem:[%s1390_s1 + $0x60] sm:$0xff]  }
   0x5   :  { %949 = vmatprep.subr.bf16.mxu1 %v1124_v1  ;;  %v1059_v13 = vld [vmem:[%s1390_s1 + $0x38] sm:$0xff]   ;;  %v16_v14 = vld [vmem:[%s1389_s0] sm:$0xff]  ;;  %v17_v15 = vld [vmem:[%s1389_s0 + $0x8] sm:$0xff] }
   0x6   :  { %930 = vmatpush3.bf16.msra.mxu0 %v1053_v2  ;;  %v1065_v16 = vld [vmem:[%s1390_s1 + $0x68] sm:$0xff]   ;;  %v18_v17 = vpack.c.bf16 %v17_v15, %v16_v14 }
   0x7   :  { %931 = vmatprep.subr.bf16.mxu0 %v1124_v1 }
   0x8   :  { %950 = vmatpush3.bf16.msra.mxu1 %v1061_v6 }
   0x9   :  { %951 = vmatprep.subr.bf16.mxu1 %v1124_v1 }
   0xa   :  { %932 = vmatpush3.bf16.msra.mxu0 %v1054_v3 }
   0xb   :  { %933 = vmatprep.subr.bf16.mxu0 %v1124_v1 }
   0xc   :  { %952 = vmatpush3.bf16.msra.mxu1 %v1062_v8 }
   0xd   :  { %953 = vmatprep.subr.bf16.mxu1 %v1124_v1 }
   0xe   :  { %934 = vmatpush3.bf16.msra.mxu0 %v1055_v5 }
   0xf   :  { %935 = vmatprep.subr.bf16.mxu0 %v1124_v1 }
  0x10   :  { %954 = vmatpush3.bf16.msra.mxu1 %v1063_v10 }
  0x11   :  { %955 = vmatprep.subr.bf16.mxu1 %v1124_v1 }
  0x12   :  { %936 = vmatpush3.bf16.msra.mxu0 %v1056_v7 }
  0x13   :  { %937 = vmatprep.subr.bf16.mxu0 %v1124_v1 }
  0x14   :  { %956 = vmatpush3.bf16.msra.mxu1 %v1064_v12 }
  0x15   :  { %957 = vmatprep.subr.bf16.mxu1 %v1124_v1 }
  0x16   :  { %938 = vmatpush3.bf16.msra.mxu0 %v1057_v9 }
  0x17   :  { %939 = vmatprep.subr.bf16.mxu0 %v1124_v1 }
  0x18   :  { %958 = vmatpush3.bf16.msra.mxu1 %v1065_v16 }
  0x19   :  { %959 = vmatprep.subr.bf16.mxu1 %v1124_v1 }
  0x1a   :  { %940 = vmatpush3.bf16.msra.mxu0 %v1058_v11 }
  0x1b   :  { %941 = vmatprep.subr.bf16.mxu0 %v1124_v1 }
  0x1e   :  { %942 = vmatpush3.bf16.msra.mxu0 %v1059_v13 }
  0x1f   :  { %967 = vmatprep.subr.bf16.mxu0 %v1124_v1 }
  0x21   :  { %944 = vmatmul.mubr.bf16.vlgmr.msra.gmra.mrb[0].mxu0 %v18_v17 }
  0x22   :  { %983 = vmatprep.mubr.msk.bf16.mxu0 %vm1125_vm0, %v1124_v1 }
  0x23   :  { %8 = vsyncpa [#allocation3], 0  ;;  %v1066_v18 = vld [vmem:[%s1390_s1 + $0x70] sm:$0xff]   ;;  %v1067_v19 = vld [vmem:[%s1390_s1 + $0x78] sm:$0xff]  }
  0x24   :  { %960 = vmatpush3.bf16.msra.mxu1 %v1066_v18  ;;  %v1068_v20 = vld [vmem:[%s1390_s1 + $0x80] sm:$0xff]   ;;  %v1069_v21 = vld [vmem:[%s1390_s1 + $0x88] sm:$0xff]   ;;  %v1070_v22 = vld [vmem:[%s1390_s1 + $0x90] sm:$0xff]  }
  0x25   :  { %961 = vmatprep.subr.bf16.mxu1 %v1124_v1  ;;  %968 = vmatpush3.bf16.msra.mxu0 %v1068_v20  ;;  %v1071_v23 = vld [vmem:[%s1390_s1 + $0x98] sm:$0xff]   ;;  %v1072_v24 = vld [vmem:[%s1390_s1 + $0xa0] sm:$0xff]   ;;  %v1073_v25 = vld [vmem:[%s1390_s1 + $0xa8] sm:$0xff]  }
  0x26   :  { %969 = vmatprep.subr.bf16.mxu0 %v1124_v1  ;;  %v734_v26 = vld [vmem:[%s1391_s2] ss:$0 sm:$0xff]  ;;  %v1074_v36 = vld [vmem:[%s1390_s1 + $0xb0] sm:$0xff]   ;;  %v1075_v37 = vld [vmem:[%s1390_s1 + $0xb8] sm:$0xff]  }
  0x27   :  { %v1076_v38 = vld [vmem:[%s1390_s1 + $0xc0] sm:$0xff]   ;;  %v1077_v39 = vld [vmem:[%s1390_s1 + $0xc8] sm:$0xff]   ;;  %v1078_v40 = vld [vmem:[%s1390_s1 + $0xd0] sm:$0xff]  }
  0x28   :  { %962 = vmatpush3.bf16.msra.mxu1 %v1067_v19  ;;  %v1079_v41 = vld [vmem:[%s1390_s1 + $0xd8] sm:$0xff]   ;;  %v1080_v42 = vld [vmem:[%s1390_s1 + $0xe0] sm:$0xff]   ;;  %v1081_v43 = vld [vmem:[%s1390_s1 + $0xe8] sm:$0xff]  }
  0x29   :  { %987 = vmatprep.subr.bf16.mxu1 %v1124_v1  ;;  %970 = vmatpush3.bf16.msra.mxu0 %v1069_v21  ;;  %v760_v44 = vld [vmem:[%s1391_s2 + $0x1] ss:$0 sm:$0xff]  ;;  %v1082_v54 = vld [vmem:[%s1390_s1 + $0xf0] sm:$0xff]   ;;  %v1083_v55 = vld [vmem:[%s1390_s1 + $0xf8] sm:$0xff]  }
  0x2a   :  { %971 = vmatprep.subr.bf16.mxu0 %v1124_v1  ;;  %v1084_v56 = vld [vmem:[%s1390_s1 + $0x100] sm:$0xff]   ;;  %v1085_v57 = vld [vmem:[%s1390_s1 + $0x108] sm:$0xff]   ;;  %v1086_v58 = vld [vmem:[%s1390_s1 + $0x110] sm:$0xff]  }
  0x2b   :  { %v1087_v59 = vld [vmem:[%s1390_s1 + $0x118] sm:$0xff]   ;;  %v1088_v60 = vld [vmem:[%s1390_s1 + $0x120] sm:$0xff]   ;;  %v1089_v61 = vld [vmem:[%s1390_s1 + $0x128] sm:$0xff]  }
  0x2c   :  { %v786_v62 = vld [vmem:[%s1391_s2 + $0x2] ss:$0 sm:$0xff]  ;;  %v1090_v9 = vld [vmem:[%s1390_s1 + $0x130] sm:$0xff]   ;;  %v1091_v10 = vld [vmem:[%s1390_s1 + $0x138] sm:$0xff]  }
  0x2d   :  { %972 = vmatpush3.bf16.msra.mxu0 %v1070_v22  ;;  %v1092_v11 = vld [vmem:[%s1390_s1 + $0x140] sm:$0xff]   ;;  %v1093_v12 = vld [vmem:[%s1390_s1 + $0x148] sm:$0xff]   ;;  %v1094_v13 = vld [vmem:[%s1390_s1 + $0x150] sm:$0xff]  }
  0x2e   :  { %973 = vmatprep.subr.bf16.mxu0 %v1124_v1  ;;  %v1095_v14 = vld [vmem:[%s1390_s1 + $0x158] sm:$0xff]   ;;  %v1096_v15 = vld [vmem:[%s1390_s1 + $0x160] sm:$0xff]   ;;  %v1097_v16 = vld [vmem:[%s1390_s1 + $0x168] sm:$0xff]  }
  0x2f   :  { %v812_v17 = vld [vmem:[%s1391_s2 + $0x3] ss:$0 sm:$0xff] }
  0x31   :  { %974 = vmatpush3.bf16.msra.mxu0 %v1071_v23 }
  0x32   :  { %975 = vmatprep.subr.bf16.mxu0 %v1124_v1 }
  0x35   :  { %976 = vmatpush3.bf16.msra.mxu0 %v1072_v24 }
  0x36   :  { %977 = vmatprep.subr.bf16.mxu0 %v1124_v1 }
  0x39   :  { %978 = vmatpush3.bf16.msra.mxu0 %v1073_v25 }
  0x3a   :  { %979 = vmatprep.subr.bf16.mxu0 %v1124_v1 }
  0x3d   :  { %980 = vmatpush3.bf16.msra.mxu0 %v1074_v36 }
  0x3e   :  { %981 = vmatprep.subr.bf16.mxu0 %v1124_v1 }
  0x41   :  { %982 = vmatpush3.bf16.msra.mxu0 %v1075_v37 }
  0x42   :  { %1007 = vmatprep.subr.bf16.mxu0 %v1124_v1 }
  0xf4   :  { %v124_v27 = vpop.f32.mrb[0].mxu0 }
  0xf5   :  { %v125_v28 = vadd.f32 %v734_v26, %v124_v27  ;;  %v945_v29 = vpop.f32.mrb[1].mxu0  ;;  %v1098_v27 = vld [vmem:[%s1390_s1 + $0x170] sm:$0xff]  }
  0xf6   :  { %v127_v30 = vpop.f32.mrb[2].mxu0  ;;  %v838_v29 = vld [vmem:[%s1391_s2 + $0x4] ss:$0 sm:$0xff] }
  0xf7   :  { %v128_v31 = vadd.f32 %v734_v26, %v127_v30  ;;  %v946_v32 = vpop.f32.mrb[3].mxu0  ;;  %v131_v33 = vmax.f32 %v125_v28, 0.0  ;;  %v1099_v28 = vld [vmem:[%s1390_s1 + $0x178] sm:$0xff]   ;;  %s1126_s1 = smov [#allocation2]  }
  0xf8   :  { %s723_s13 = sshll.u32 %s1126_s1, 4  ;;  %s724_s13 = int_to_ptr.vmem [resolvable:$true] %s723_s13 }
  0xf9   :  { %v132_v34 = vmax.f32 %v128_v31, 0.0  ;;  %s1100_s14 = scalar_lea.vmem %s724_s13, 256  ;;  %p1105_p1 = scmp.lt.s32.totalorder %s724_s13, %s724_s13 }
  0xfa   :  { %p1101_p0 = scmp.ne.s32.totalorder %s724_s13, %s1100_s14  ;;  %p1106_p2 = scmp.lt.s32.totalorder %s1100_s14, %s1100_s14 }
  0xfb   :  { %v133_v35 = vpack.c.bf16 %v132_v34, %v131_v33 }
  0xfc   :  { %p1107_p3 = por %p1106_p2, %p1105_p1 }
  0xfd   :  { %964 = vmatmul.mubr.bf16.vlgmr.msra.gmra.mrb[0].mxu1 %v133_v35 }
  0xfe   :  { %1003 = vmatprep.mubr.msk.bf16.mxu1 %vm1125_vm0, %v1124_v1  ;;  %988 = vmatpush3.bf16.msra.mxu1 %v1076_v38  ;;  %p1108_p4 = pnand %p1107_p3, %p1101_p0 }
  0xff   :  { %989 = vmatprep.subr.bf16.mxu1 %v1124_v1 }
 0x102   :  { %990 = vmatpush3.bf16.msra.mxu1 %v1077_v39 }
 0x103   :  { %991 = vmatprep.subr.bf16.mxu1 %v1124_v1 }
 0x106   :  { %992 = vmatpush3.bf16.msra.mxu1 %v1078_v40 }
 0x107   :  { %993 = vmatprep.subr.bf16.mxu1 %v1124_v1 }
 0x10a   :  { %994 = vmatpush3.bf16.msra.mxu1 %v1079_v41 }
 0x10b   :  { %995 = vmatprep.subr.bf16.mxu1 %v1124_v1 }
 0x10e   :  { %996 = vmatpush3.bf16.msra.mxu1 %v1080_v42 }
 0x10f   :  { %997 = vmatprep.subr.bf16.mxu1 %v1124_v1 }
 0x112   :  { %998 = vmatpush3.bf16.msra.mxu1 %v1081_v43 }
 0x113   :  { %999 = vmatprep.subr.bf16.mxu1 %v1124_v1 }
 0x116   :  { %1000 = vmatpush3.bf16.msra.mxu1 %v1082_v54 }
 0x117   :  { %1001 = vmatprep.subr.bf16.mxu1 %v1124_v1 }
 0x11a   :  { %1002 = vmatpush3.bf16.msra.mxu1 %v1083_v55 }
 0x11b   :  { %1027 = vmatprep.subr.bf16.mxu1 %v1124_v1 }
 0x1d0   :  { %v241_v45 = vpop.f32.mrb[0].mxu1 }
 0x1d1   :  { %v242_v46 = vadd.f32 %v760_v44, %v241_v45  ;;  %v965_v47 = vpop.f32.mrb[1].mxu1 }
 0x1d2   :  { %v244_v48 = vpop.f32.mrb[2].mxu1 }
 0x1d3   :  { %v245_v49 = vadd.f32 %v760_v44, %v244_v48  ;;  %v966_v50 = vpop.f32.mrb[3].mxu1  ;;  %v248_v51 = vmax.f32 %v242_v46, 0.0 }
 0x1d5   :  { %v249_v52 = vmax.f32 %v245_v49, 0.0 }
 0x1d7   :  { %v250_v53 = vpack.c.bf16 %v249_v52, %v248_v51 }
 0x1d9   :  { %984 = vmatmul.mubr.bf16.vlgmr.msra.gmra.mrb[4].mxu0 %v250_v53 }
 0x1da   :  { %1023 = vmatprep.mubr.msk.bf16.mxu0 %vm1125_vm0, %v1124_v1  ;;  %1008 = vmatpush3.bf16.msra.mxu0 %v1084_v56 }
 0x1db   :  { %1009 = vmatprep.subr.bf16.mxu0 %v1124_v1 }
 0x1de   :  { %1010 = vmatpush3.bf16.msra.mxu0 %v1085_v57 }
 0x1df   :  { %1011 = vmatprep.subr.bf16.mxu0 %v1124_v1 }
 0x1e2   :  { %1012 = vmatpush3.bf16.msra.mxu0 %v1086_v58 }
 0x1e3   :  { %1013 = vmatprep.subr.bf16.mxu0 %v1124_v1 }
 0x1e6   :  { %1014 = vmatpush3.bf16.msra.mxu0 %v1087_v59 }
 0x1e7   :  { %1015 = vmatprep.subr.bf16.mxu0 %v1124_v1 }
 0x1ea   :  { %1016 = vmatpush3.bf16.msra.mxu0 %v1088_v60 }
 0x1eb   :  { %1017 = vmatprep.subr.bf16.mxu0 %v1124_v1 }
 0x1ee   :  { %1018 = vmatpush3.bf16.msra.mxu0 %v1089_v61 }
 0x1ef   :  { %1019 = vmatprep.subr.bf16.mxu0 %v1124_v1 }
 0x1f2   :  { %1020 = vmatpush3.bf16.msra.mxu0 %v1090_v9 }
 0x1f3   :  { %1021 = vmatprep.subr.bf16.mxu0 %v1124_v1 }
 0x1f6   :  { %1022 = vmatpush3.bf16.msra.mxu0 %v1091_v10 }
 0x2ac   :  { %v358_v63 = vpop.f32.mrb[4].mxu0 }
 0x2ad   :  { %v359_v0 = vadd.f32 %v786_v62, %v358_v63  ;;  %v985_v2 = vpop.f32.mrb[5].mxu0 }
 0x2ae   :  { %v361_v3 = vpop.f32.mrb[6].mxu0 }
 0x2af   :  { %v362_v4 = vadd.f32 %v786_v62, %v361_v3  ;;  %v986_v5 = vpop.f32.mrb[7].mxu0  ;;  %v365_v6 = vmax.f32 %v359_v0, 0.0 }
 0x2b1   :  { %v366_v7 = vmax.f32 %v362_v4, 0.0 }
 0x2b3   :  { %v367_v8 = vpack.c.bf16 %v366_v7, %v365_v6 }
 0x2b5   :  { %1004 = vmatmul.mubr.bf16.vlgmr.msra.gmra.mrb[4].mxu1 %v367_v8 }
 0x2b6   :  { %1043 = vmatprep.mubr.msk.bf16.mxu1 %vm1125_vm0, %v1124_v1  ;;  %1028 = vmatpush3.bf16.msra.mxu1 %v1092_v11 }
 0x2b7   :  { %1029 = vmatprep.subr.bf16.mxu1 %v1124_v1 }
 0x2ba   :  { %1030 = vmatpush3.bf16.msra.mxu1 %v1093_v12 }
 0x2bb   :  { %1031 = vmatprep.subr.bf16.mxu1 %v1124_v1 }
 0x2be   :  { %1032 = vmatpush3.bf16.msra.mxu1 %v1094_v13 }
 0x2bf   :  { %1033 = vmatprep.subr.bf16.mxu1 %v1124_v1 }
 0x2c2   :  { %1034 = vmatpush3.bf16.msra.mxu1 %v1095_v14 }
 0x2c3   :  { %1035 = vmatprep.subr.bf16.mxu1 %v1124_v1 }
 0x2c6   :  { %1036 = vmatpush3.bf16.msra.mxu1 %v1096_v15 }
 0x2c7   :  { %1037 = vmatprep.subr.bf16.mxu1 %v1124_v1 }
 0x2ca   :  { %1038 = vmatpush3.bf16.msra.mxu1 %v1097_v16 }
 0x2cb   :  { %1039 = vmatprep.subr.bf16.mxu1 %v1124_v1 }
 0x2ce   :  { %1040 = vmatpush3.bf16.msra.mxu1 %v1098_v27 }
 0x2cf   :  { %1041 = vmatprep.subr.bf16.mxu1 %v1124_v1  ;;  %v864_v1 = vld [vmem:[%s1391_s2 + $0x5] ss:$0 sm:$0xff] }
 0x2d2   :  { %1042 = vmatpush3.bf16.msra.mxu1 %v1099_v28 }
 0x388   :  { %v475_v18 = vpop.f32.mrb[4].mxu1 }
 0x389   :  { %v476_v19 = vadd.f32 %v812_v17, %v475_v18  ;;  %v1005_v20 = vpop.f32.mrb[5].mxu1 }
 0x38a   :  { %v478_v21 = vpop.f32.mrb[6].mxu1 }
 0x38b   :  { %v479_v22 = vadd.f32 %v812_v17, %v478_v21  ;;  %v1006_v23 = vpop.f32.mrb[7].mxu1  ;;  %v482_v24 = vmax.f32 %v476_v19, 0.0 }
 0x38d   :  { %v483_v25 = vmax.f32 %v479_v22, 0.0 }
 0x38f   :  { %v484_v26 = vpack.c.bf16 %v483_v25, %v482_v24 }
 0x391   :  { %1024 = vmatmul.mubr.bf16.vlgmr.msra.gmra.mrb[8].mxu0 %v484_v26 }
 0x464   :  { %v592_v30 = vpop.f32.mrb[8].mxu0 }
 0x465   :  { %v593_v31 = vadd.f32 %v838_v29, %v592_v30  ;;  %v1025_v32 = vpop.f32.mrb[9].mxu0 }
 0x466   :  { %v595_v33 = vpop.f32.mrb[10].mxu0 }
 0x467   :  { %v596_v34 = vadd.f32 %v838_v29, %v595_v33  ;;  %v1026_v35 = vpop.f32.mrb[11].mxu0  ;;  %v599_v36 = vmax.f32 %v593_v31, 0.0 }
 0x469   :  { %v600_v37 = vmax.f32 %v596_v34, 0.0 }
 0x46b   :  { %v601_v38 = vpack.c.bf16 %v600_v37, %v599_v36 }
 0x46d   :  { %1044 = vmatmul.mubr.bf16.vlgmr.msra.gmra.mrb[8].mxu1 %v601_v38 }
 0x540   :  { %v709_v39 = vpop.f32.mrb[8].mxu1 }
 0x541   :  { %v710_v40 = vadd.f32 %v864_v1, %v709_v39  ;;  %v1045_v41 = vpop.f32.mrb[9].mxu1 }
 0x542   :  { %v712_v42 = vpop.f32.mrb[10].mxu1 }
 0x543   :  { %716 = vst [vmem:[#allocation2] sm:$0xff] %v710_v40  ;;  %v713_v43 = vadd.f32 %v864_v1, %v712_v42  ;;  %v1046_v44 = vpop.f32.mrb[11].mxu1 }
 0x545   :  { %717 = vst [vmem:[#allocation2 + $0x8] sm:$0xff] %v713_v43 }
 0x546   :  { %1111 = shalt.err (!%p1108_p4)
}
 0x547   :  { %s1112_s16 = scalar_lea.hbm %s1392_s3, 256 }
 0x548   :  { %p1113_p5 = scmp.ne.s32.totalorder %s1392_s3, %s1112_s16  ;;  %p1116_p6 = scmp.lt.u32.totalorder %s1112_s16, %s1392_s3 }
 0x54a   :  { %p1118_p7 = pnand %p1116_p6, %p1113_p5 }
 0x54c   :  { %1121 = shalt.err (!%p1118_p7)
}
 0x54d   :  { %s1127_s20 = smov 128   ;;  %s1128_s21 = smov 8  }
 0x54e   :  { %729 = dma.vmem_to_hbm [thread:$0]  %s724_s13, 256, %s1392_s3, [#allocation3], %s1127_s20, %s1127_s20, %s1128_s21  }
 0x54f   :  { %1122 = dma.done.wait [#allocation3], 256  }
 0x550   :  { %1123 = vsyncadd [#allocation3], 4294967040 }
 0x551   :  { %733 = vsyncpa [#allocation3], 1 }

</bundles_post_ra>
